<compile_context>
chip_gen: v6e
topology: v6e:2x2x1
jax: 0.10.0
libtpu: 0.0.40
codegen_flags: <defaults>
</compile_context>

<pallas_src>
import jax
import jax.numpy as jnp
from jax.experimental import pallas as pl
from jax.experimental.pallas import tpu as pltpu

LANE = 128
SUBLANE = 8


def _round_up(x, m):
    return ((x + m - 1) // m) * m


def _pad2(a, rows, cols):
    return jnp.pad(a, ((0, rows - a.shape[0]), (0, cols - a.shape[1])))


def _deep_classifier_kernel(
    x_ref,
    wp_ref, bp_ref,      # Highway.proj
    wt_ref, bt_ref,      # Highway.transform
    w1_ref, b1_ref,      # fc1
    w2_ref, b2_ref,      # fc2
    w3_ref, b3_ref,      # fc3
    wc_ref, bc_ref,      # classifier (padded to 128-lane output)
    out_ref,
):
    x = x_ref[...].astype(jnp.float32)

    def linear(a, w_ref, b_ref):
        w = w_ref[...]
        # Operands in the weight dtype (f32 or bf16), f32 accumulation on MXU.
        y = jnp.dot(a.astype(w.dtype), w, preferred_element_type=jnp.float32)
        return y + b_ref[...].astype(jnp.float32)

    # ---- Highway block ----
    proj = jnp.maximum(linear(x, wp_ref, bp_ref), 0.0)        # relu
    gate = jax.nn.sigmoid(linear(x, wt_ref, bt_ref))
    h = x + gate * (proj - x)                                  # == g*proj + (1-g)*x

    # ---- fc1 -> tanh -> fc2 -> tanh -> fc3 -> tanh -> classifier ----
    h1 = jnp.tanh(linear(h, w1_ref, b1_ref))
    h2 = jnp.tanh(linear(h1, w2_ref, b2_ref))
    h3 = jnp.tanh(linear(h2, w3_ref, b3_ref))
    logits = linear(h3, wc_ref, bc_ref)                        # (TILE_B, N_PAD)

    out_ref[...] = logits.astype(out_ref.dtype)


def _vmem_capacity_bytes():
    """Per-core VMEM capacity with headroom; generation-aware when queryable."""
    try:
        cap = int(pltpu.get_tpu_info().vmem_capacity_bytes)
    except Exception:
        cap = 64 * 1024 * 1024          # conservative fallback (v7x-sized)
    return int(cap * 0.85)              # ~108 MiB on v5e/v6e, ~54 MiB on v7x


def _resident_spec(shape):
    """Whole-array block, constant index -> stays in VMEM, single-buffered."""
    idx = lambda i: (0,) * len(shape)
    if hasattr(pl, "Buffered"):
        try:
            return pl.BlockSpec(shape, idx, pipeline_mode=pl.Buffered(1))
        except Exception:
            pass
    return pl.BlockSpec(shape, idx)


def deep_classifier_forward(x, params, *, tile_b=512, use_bf16=None):
    """x: [B, input_size] float32.  params: dict of (weight[in,out], bias[1,out]).

    use_bf16: None -> auto (bf16 MXU operands for non-toy sizes or when f32
    weights would not fit VMEM); True/False forces it.  Accumulation and all
    activations are always f32.
    """
    B, F = x.shape
    H = params["w1"].shape[1]
    H2 = params["w2"].shape[1]
    H3 = params["w3"].shape[1]
    n_out = params["wc"].shape[1]

    # ---- lane-pad every feature dim to a multiple of 128 (math stays exact:
    #      zero weight rows/cols, zero biases, zero-padded x columns) ----
    F_pad = _round_up(F, LANE)
    H1_pad = _round_up(H, LANE)
    H2_pad = _round_up(H2, LANE)
    H3_pad = _round_up(H3, LANE)
    N_pad = _round_up(n_out, LANE)

    weights = dict(
        wp=_pad2(params["wp"], F_pad, F_pad),
        wt=_pad2(params["wt"], F_pad, F_pad),
        w1=_pad2(params["w1"], F_pad, H1_pad),
        w2=_pad2(params["w2"], H1_pad, H2_pad),
        w3=_pad2(params["w3"], H2_pad, H3_pad),
        wc=_pad2(params["wc"], H3_pad, N_pad),
    )
    biases = dict(
        bp=_pad2(params["bp"], 1, F_pad),
        bt=_pad2(params["bt"], 1, F_pad),
        b1=_pad2(params["b1"], 1, H1_pad),
        b2=_pad2(params["b2"], 1, H2_pad),
        b3=_pad2(params["b3"], 1, H3_pad),
        bc=_pad2(params["bc"], 1, N_pad),
    )

    vmem_cap = _vmem_capacity_bytes()
    bias_bytes = sum(4 * int(b.size) for b in biases.values())
    f32_weight_bytes = sum(4 * int(w.size) for w in weights.values()) + bias_bytes

    if use_bf16 is None:
        # bf16 for realistic sizes (full-rate MXU, half the weight residency),
        # or whenever f32 weights would crowd out the batch tiles.
        use_bf16 = (max(F_pad, H1_pad) >= 512) or (f32_weight_bytes > 0.45 * vmem_cap)
    if use_bf16:
        weights = {k: v.astype(jnp.bfloat16) for k, v in weights.items()}

    weight_bytes = (sum(int(w.size) * w.dtype.itemsize for w in weights.values())
                    + bias_bytes)
    if weight_bytes > 0.9 * vmem_cap:
        # TODO(synk): switch to the K-tiled accumulator path instead of bailing.
        raise NotImplementedError(
            f"resident weights ({weight_bytes} B) exceed the per-core VMEM "
            f"budget ({vmem_cap} B); K-tiled accumulator path not implemented")

    # ---- batch tiling: multiple of 8, >=2 grid steps when batch allows (v7x
    #      dual-TC), auto-shrunk to fit the VMEM budget ----
    tile_b = _round_up(max(SUBLANE, int(tile_b)), SUBLANE)
    B_pad8 = _round_up(B, SUBLANE)
    tile_b = min(tile_b, B_pad8)
    if B_pad8 >= 2 * SUBLANE:
        tile_b = min(tile_b, _round_up((B_pad8 + 1) // 2, SUBLANE))

    act_width = max(F_pad, H1_pad, H2_pad, H3_pad, N_pad)

    def vmem_need(tb):
        io_tiles = 2 * tb * (F_pad + N_pad) * 4          # double-buffered x / out
        live_acts = 6 * tb * act_width * 4               # rough live f32 activations
        return weight_bytes + io_tiles + live_acts

    while tile_b > SUBLANE and vmem_need(tile_b) > vmem_cap:
        tile_b = max(SUBLANE, _round_up(tile_b // 2, SUBLANE))

    B_pad = _round_up(B, tile_b)
    grid = (B_pad // tile_b,)

    x_p = _pad2(x, B_pad, F_pad)

    args = (
        x_p,
        weights["wp"], biases["bp"],
        weights["wt"], biases["bt"],
        weights["w1"], biases["b1"],
        weights["w2"], biases["b2"],
        weights["w3"], biases["b3"],
        weights["wc"], biases["bc"],
    )

    in_specs = [pl.BlockSpec((tile_b, F_pad), lambda i: (i, 0))]
    in_specs += [_resident_spec(a.shape) for a in args[1:]]
    out_spec = pl.BlockSpec((tile_b, N_pad), lambda i: (i, 0))

    vmem_limit = int(min(vmem_cap, max(32 * 1024 * 1024, int(1.25 * vmem_need(tile_b)))))

    # ---- advisory cost estimate (counts the padded work actually executed) ----
    flops = 2 * B_pad * (2 * F_pad * F_pad + F_pad * H1_pad + H1_pad * H2_pad
                         + H2_pad * H3_pad + H3_pad * N_pad)
    transcendentals = B_pad * (F_pad + H1_pad + H2_pad + H3_pad)
    bytes_accessed = B_pad * F_pad * 4 + weight_bytes + B_pad * N_pad * 4

    out_padded = pl.pallas_call(
        _deep_classifier_kernel,
        out_shape=jax.ShapeDtypeStruct((B_pad, N_pad), jnp.float32),
        grid=grid,
        in_specs=in_specs,
        out_specs=out_spec,
        compiler_params=pltpu.CompilerParams(
            dimension_semantics=("parallel",),
            vmem_limit_bytes=vmem_limit,
        ),
        cost_estimate=pl.CostEstimate(
            flops=int(flops),
            transcendentals=int(transcendentals),
            bytes_accessed=int(bytes_accessed),
        ),
    )(*args)

    return out_padded[:B, :n_out]


def init_params(key, input_size, hidden_size):
    """Deterministic init mimicking PyTorch nn.Linear defaults (uniform +-1/sqrt(fan_in)).
    Weights stored as [in, out] (transposed w.r.t. torch's [out, in])."""
    def linear(k, fan_in, fan_out, bias_fill=None):
        kw, kb = jax.random.split(k)
        bound = 1.0 / jnp.sqrt(fan_in)
        w = jax.random.uniform(kw, (fan_in, fan_out), jnp.float32, -bound, bound)
        if bias_fill is None:
            b = jax.random.uniform(kb, (1, fan_out), jnp.float32, -bound, bound)
        else:
            b = jnp.full((1, fan_out), bias_fill, jnp.float32)
        return w, b

    ks = jax.random.split(key, 6)
    wp, bp = linear(ks[0], input_size, input_size)
    wt, bt = linear(ks[1], input_size, input_size, bias_fill=-2.0)  # transform.bias.fill_(-2.0)
    w1, b1 = linear(ks[2], input_size, hidden_size)
    w2, b2 = linear(ks[3], hidden_size, hidden_size // 2)
    w3, b3 = linear(ks[4], hidden_size // 2, hidden_size // 4)
    wc, bc = linear(ks[5], hidden_size // 4, 2)
    return dict(wp=wp, bp=bp, wt=wt, bt=bt, w1=w1, b1=b1,
                w2=w2, b2=b2, w3=w3, b3=b3, wc=wc, bc=bc)


def reference_forward(x, p):
    """Pure-JAX reference (dropout = identity, eval mode)."""
    proj = jax.nn.relu(x @ p["wp"] + p["bp"])
    gate = jax.nn.sigmoid(x @ p["wt"] + p["bt"])
    h = gate * proj + (1.0 - gate) * x
    h1 = jnp.tanh(h @ p["w1"] + p["b1"])
    h2 = jnp.tanh(h1 @ p["w2"] + p["b2"])
    h3 = jnp.tanh(h2 @ p["w3"] + p["b3"])
    return h3 @ p["wc"] + p["bc"]


if __name__ == "__main__":
    input_size = 32
    hidden_size = 32
    batch = 8

    key = jax.random.PRNGKey(0)
    kx, kp = jax.random.split(key)
    x = jax.random.normal(kx, (batch, input_size), jnp.float32)
    params = init_params(kp, input_size, hidden_size)

    # Toy sizes -> auto path keeps f32 MXU operands, so the 1e-5 check holds.
    out = deep_classifier_forward(x, params, tile_b=512, use_bf16=None)
    out = jax.block_until_ready(out)

    ref = reference_forward(x, params)
    assert out.shape == (batch, 2), out.shape
    assert jnp.allclose(out, ref, atol=1e-5, rtol=1e-5), (
        f"max abs err = {jnp.max(jnp.abs(out - ref))}"
    )
    print("KERNEL_OK")
</pallas_src>

<mosaic_0001>
module attributes {stable_mosaic.version = 11 : i64} {
  func.func @_deep_classifier_kernel(%arg0: i32, %arg1: memref<8x128xf32, #tpu.memory_space<vmem>>, %arg2: memref<128x128xf32, #tpu.memory_space<vmem>>, %arg3: memref<1x128xf32, #tpu.memory_space<vmem>>, %arg4: memref<128x128xf32, #tpu.memory_space<vmem>>, %arg5: memref<1x128xf32, #tpu.memory_space<vmem>>, %arg6: memref<128x128xf32, #tpu.memory_space<vmem>>, %arg7: memref<1x128xf32, #tpu.memory_space<vmem>>, %arg8: memref<128x128xf32, #tpu.memory_space<vmem>>, %arg9: memref<1x128xf32, #tpu.memory_space<vmem>>, %arg10: memref<128x128xf32, #tpu.memory_space<vmem>>, %arg11: memref<1x128xf32, #tpu.memory_space<vmem>>, %arg12: memref<128x128xf32, #tpu.memory_space<vmem>>, %arg13: memref<1x128xf32, #tpu.memory_space<vmem>>, %arg14: memref<8x128xf32, #tpu.memory_space<vmem>>) attributes {dimension_semantics = [#tpu.dimension_semantics<parallel>], iteration_bounds = array<i64: 1>, scalar_prefetch = 0 : i64, scratch_operands = 0 : i64, tpu.core_type = #tpu.core_type<tc>, window_params = [{transform_indices = @transform_0, window_bounds = array<i64: 8, 128>}, {pipeline_mode = #tpu.pipeline_mode<synchronous>, transform_indices = @transform_1, window_bounds = array<i64: 128, 128>}, {pipeline_mode = #tpu.pipeline_mode<synchronous>, transform_indices = @transform_2, window_bounds = array<i64: 1, 128>}, {pipeline_mode = #tpu.pipeline_mode<synchronous>, transform_indices = @transform_3, window_bounds = array<i64: 128, 128>}, {pipeline_mode = #tpu.pipeline_mode<synchronous>, transform_indices = @transform_4, window_bounds = array<i64: 1, 128>}, {pipeline_mode = #tpu.pipeline_mode<synchronous>, transform_indices = @transform_5, window_bounds = array<i64: 128, 128>}, {pipeline_mode = #tpu.pipeline_mode<synchronous>, transform_indices = @transform_6, window_bounds = array<i64: 1, 128>}, {pipeline_mode = #tpu.pipeline_mode<synchronous>, transform_indices = @transform_7, window_bounds = array<i64: 128, 128>}, {pipeline_mode = #tpu.pipeline_mode<synchronous>, transform_indices = @transform_8, window_bounds = array<i64: 1, 128>}, {pipeline_mode = #tpu.pipeline_mode<synchronous>, transform_indices = @transform_9, window_bounds = array<i64: 128, 128>}, {pipeline_mode = #tpu.pipeline_mode<synchronous>, transform_indices = @transform_10, window_bounds = array<i64: 1, 128>}, {pipeline_mode = #tpu.pipeline_mode<synchronous>, transform_indices = @transform_11, window_bounds = array<i64: 128, 128>}, {pipeline_mode = #tpu.pipeline_mode<synchronous>, transform_indices = @transform_12, window_bounds = array<i64: 1, 128>}, {transform_indices = @transform_13, window_bounds = array<i64: 8, 128>}]} {
    %c0 = arith.constant 0 : index
    %c0_0 = arith.constant 0 : index
    %0 = vector.load %arg1[%c0, %c0_0] : memref<8x128xf32, #tpu.memory_space<vmem>>, vector<8x128xf32>
    %c0_1 = arith.constant 0 : index
    %c0_2 = arith.constant 0 : index
    %1 = vector.load %arg2[%c0_1, %c0_2] : memref<128x128xf32, #tpu.memory_space<vmem>>, vector<128x128xf32>
    %cst = arith.constant dense<0.000000e+00> : vector<8x128xf32>
    %2 = tpu.matmul %0, %1, %cst {dimension_numbers = #tpu.dot_dimension_numbers<[1], [0], [0], [1], [0, 0, 1, 1], [], []>} : vector<8x128xf32>, vector<128x128xf32>, vector<8x128xf32> -> vector<8x128xf32>
    %c0_3 = arith.constant 0 : index
    %c0_4 = arith.constant 0 : index
    %3 = vector.load %arg3[%c0_3, %c0_4] : memref<1x128xf32, #tpu.memory_space<vmem>>, vector<1x128xf32>
    %4 = vector.broadcast %3 : vector<1x128xf32> to vector<8x128xf32>
    %5 = arith.addf %2, %4 : vector<8x128xf32>
    %cst_5 = arith.constant 0.000000e+00 : f32
    %6 = vector.broadcast %cst_5 : f32 to vector<8x128xf32>
    %7 = arith.maximumf %5, %6 : vector<8x128xf32>
    %c0_6 = arith.constant 0 : index
    %c0_7 = arith.constant 0 : index
    %8 = vector.load %arg4[%c0_6, %c0_7] : memref<128x128xf32, #tpu.memory_space<vmem>>, vector<128x128xf32>
    %cst_8 = arith.constant dense<0.000000e+00> : vector<8x128xf32>
    %9 = tpu.matmul %0, %8, %cst_8 {dimension_numbers = #tpu.dot_dimension_numbers<[1], [0], [0], [1], [0, 0, 1, 1], [], []>} : vector<8x128xf32>, vector<128x128xf32>, vector<8x128xf32> -> vector<8x128xf32>
    %c0_9 = arith.constant 0 : index
    %c0_10 = arith.constant 0 : index
    %10 = vector.load %arg5[%c0_9, %c0_10] : memref<1x128xf32, #tpu.memory_space<vmem>>, vector<1x128xf32>
    %11 = vector.broadcast %10 : vector<1x128xf32> to vector<8x128xf32>
    %12 = arith.addf %9, %11 : vector<8x128xf32>
    %13 = arith.negf %12 : vector<8x128xf32>
    %14 = math.exp %13 : vector<8x128xf32>
    %cst_11 = arith.constant 1.000000e+00 : f32
    %15 = vector.broadcast %cst_11 : f32 to vector<8x128xf32>
    %16 = arith.addf %15, %14 : vector<8x128xf32>
    %17 = arith.divf %15, %16 : vector<8x128xf32>
    %18 = arith.subf %7, %0 : vector<8x128xf32>
    %19 = arith.mulf %17, %18 : vector<8x128xf32>
    %20 = arith.addf %0, %19 : vector<8x128xf32>
    %c0_12 = arith.constant 0 : index
    %c0_13 = arith.constant 0 : index
    %21 = vector.load %arg6[%c0_12, %c0_13] : memref<128x128xf32, #tpu.memory_space<vmem>>, vector<128x128xf32>
    %cst_14 = arith.constant dense<0.000000e+00> : vector<8x128xf32>
    %22 = tpu.matmul %20, %21, %cst_14 {dimension_numbers = #tpu.dot_dimension_numbers<[1], [0], [0], [1], [0, 0, 1, 1], [], []>} : vector<8x128xf32>, vector<128x128xf32>, vector<8x128xf32> -> vector<8x128xf32>
    %c0_15 = arith.constant 0 : index
    %c0_16 = arith.constant 0 : index
    %23 = vector.load %arg7[%c0_15, %c0_16] : memref<1x128xf32, #tpu.memory_space<vmem>>, vector<1x128xf32>
    %24 = vector.broadcast %23 : vector<1x128xf32> to vector<8x128xf32>
    %25 = arith.addf %22, %24 : vector<8x128xf32>
    %26 = math.tanh %25 : vector<8x128xf32>
    %c0_17 = arith.constant 0 : index
    %c0_18 = arith.constant 0 : index
    %27 = vector.load %arg8[%c0_17, %c0_18] : memref<128x128xf32, #tpu.memory_space<vmem>>, vector<128x128xf32>
    %cst_19 = arith.constant dense<0.000000e+00> : vector<8x128xf32>
    %28 = tpu.matmul %26, %27, %cst_19 {dimension_numbers = #tpu.dot_dimension_numbers<[1], [0], [0], [1], [0, 0, 1, 1], [], []>} : vector<8x128xf32>, vector<128x128xf32>, vector<8x128xf32> -> vector<8x128xf32>
    %c0_20 = arith.constant 0 : index
    %c0_21 = arith.constant 0 : index
    %29 = vector.load %arg9[%c0_20, %c0_21] : memref<1x128xf32, #tpu.memory_space<vmem>>, vector<1x128xf32>
    %30 = vector.broadcast %29 : vector<1x128xf32> to vector<8x128xf32>
    %31 = arith.addf %28, %30 : vector<8x128xf32>
    %32 = math.tanh %31 : vector<8x128xf32>
    %c0_22 = arith.constant 0 : index
    %c0_23 = arith.constant 0 : index
    %33 = vector.load %arg10[%c0_22, %c0_23] : memref<128x128xf32, #tpu.memory_space<vmem>>, vector<128x128xf32>
    %cst_24 = arith.constant dense<0.000000e+00> : vector<8x128xf32>
    %34 = tpu.matmul %32, %33, %cst_24 {dimension_numbers = #tpu.dot_dimension_numbers<[1], [0], [0], [1], [0, 0, 1, 1], [], []>} : vector<8x128xf32>, vector<128x128xf32>, vector<8x128xf32> -> vector<8x128xf32>
    %c0_25 = arith.constant 0 : index
    %c0_26 = arith.constant 0 : index
    %35 = vector.load %arg11[%c0_25, %c0_26] : memref<1x128xf32, #tpu.memory_space<vmem>>, vector<1x128xf32>
    %36 = vector.broadcast %35 : vector<1x128xf32> to vector<8x128xf32>
    %37 = arith.addf %34, %36 : vector<8x128xf32>
    %38 = math.tanh %37 : vector<8x128xf32>
    %c0_27 = arith.constant 0 : index
    %c0_28 = arith.constant 0 : index
    %39 = vector.load %arg12[%c0_27, %c0_28] : memref<128x128xf32, #tpu.memory_space<vmem>>, vector<128x128xf32>
    %cst_29 = arith.constant dense<0.000000e+00> : vector<8x128xf32>
    %40 = tpu.matmul %38, %39, %cst_29 {dimension_numbers = #tpu.dot_dimension_numbers<[1], [0], [0], [1], [0, 0, 1, 1], [], []>} : vector<8x128xf32>, vector<128x128xf32>, vector<8x128xf32> -> vector<8x128xf32>
    %c0_30 = arith.constant 0 : index
    %c0_31 = arith.constant 0 : index
    %41 = vector.load %arg13[%c0_30, %c0_31] : memref<1x128xf32, #tpu.memory_space<vmem>>, vector<1x128xf32>
    %42 = vector.broadcast %41 : vector<1x128xf32> to vector<8x128xf32>
    %43 = arith.addf %40, %42 : vector<8x128xf32>
    %c0_32 = arith.constant 0 : index
    %c0_33 = arith.constant 0 : index
    %44 = vector.load %arg14[%c0_32, %c0_33] : memref<8x128xf32, #tpu.memory_space<vmem>>, vector<8x128xf32>
    tpu.vector_store %arg14[%c0_32, %c0_33], %43 {strides = array<i32>} : memref<8x128xf32, #tpu.memory_space<vmem>>, vector<8x128xf32>,
    return
  }
  func.func @transform_0(%arg0: i32) -> (i32, i32) {
    %c0_i32 = arith.constant 0 : i32
    %c0_i32_0 = arith.constant 0 : i32
    return %arg0, %c0_i32 : i32, i32
  }
  func.func @transform_1(%arg0: i32) -> (i32, i32) {
    %c0_i32 = arith.constant 0 : i32
    %c0_i32_0 = arith.constant 0 : i32
    %c0_i32_1 = arith.constant 0 : i32
    return %c0_i32, %c0_i32_0 : i32, i32
  }
  func.func @transform_2(%arg0: i32) -> (i32, i32) {
    %c0_i32 = arith.constant 0 : i32
    %c0_i32_0 = arith.constant 0 : i32
    %c0_i32_1 = arith.constant 0 : i32
    return %c0_i32, %c0_i32_0 : i32, i32
  }
  func.func @transform_3(%arg0: i32) -> (i32, i32) {
    %c0_i32 = arith.constant 0 : i32
    %c0_i32_0 = arith.constant 0 : i32
    %c0_i32_1 = arith.constant 0 : i32
    return %c0_i32, %c0_i32_0 : i32, i32
  }
  func.func @transform_4(%arg0: i32) -> (i32, i32) {
    %c0_i32 = arith.constant 0 : i32
    %c0_i32_0 = arith.constant 0 : i32
    %c0_i32_1 = arith.constant 0 : i32
    return %c0_i32, %c0_i32_0 : i32, i32
  }
  func.func @transform_5(%arg0: i32) -> (i32, i32) {
    %c0_i32 = arith.constant 0 : i32
    %c0_i32_0 = arith.constant 0 : i32
    %c0_i32_1 = arith.constant 0 : i32
    return %c0_i32, %c0_i32_0 : i32, i32
  }
  func.func @transform_6(%arg0: i32) -> (i32, i32) {
    %c0_i32 = arith.constant 0 : i32
    %c0_i32_0 = arith.constant 0 : i32
    %c0_i32_1 = arith.constant 0 : i32
    return %c0_i32, %c0_i32_0 : i32, i32
  }
  func.func @transform_7(%arg0: i32) -> (i32, i32) {
    %c0_i32 = arith.constant 0 : i32
    %c0_i32_0 = arith.constant 0 : i32
    %c0_i32_1 = arith.constant 0 : i32
    return %c0_i32, %c0_i32_0 : i32, i32
  }
  func.func @transform_8(%arg0: i32) -> (i32, i32) {
    %c0_i32 = arith.constant 0 : i32
    %c0_i32_0 = arith.constant 0 : i32
    %c0_i32_1 = arith.constant 0 : i32
    return %c0_i32, %c0_i32_0 : i32, i32
  }
  func.func @transform_9(%arg0: i32) -> (i32, i32) {
    %c0_i32 = arith.constant 0 : i32
    %c0_i32_0 = arith.constant 0 : i32
    %c0_i32_1 = arith.constant 0 : i32
    return %c0_i32, %c0_i32_0 : i32, i32
  }
  func.func @transform_10(%arg0: i32) -> (i32, i32) {
    %c0_i32 = arith.constant 0 : i32
    %c0_i32_0 = arith.constant 0 : i32
    %c0_i32_1 = arith.constant 0 : i32
    return %c0_i32, %c0_i32_0 : i32, i32
  }
  func.func @transform_11(%arg0: i32) -> (i32, i32) {
    %c0_i32 = arith.constant 0 : i32
    %c0_i32_0 = arith.constant 0 : i32
    %c0_i32_1 = arith.constant 0 : i32
    return %c0_i32, %c0_i32_0 : i32, i32
  }
  func.func @transform_12(%arg0: i32) -> (i32, i32) {
    %c0_i32 = arith.constant 0 : i32
    %c0_i32_0 = arith.constant 0 : i32
    %c0_i32_1 = arith.constant 0 : i32
    return %c0_i32, %c0_i32_0 : i32, i32
  }
  func.func @transform_13(%arg0: i32) -> (i32, i32) {
    %c0_i32 = arith.constant 0 : i32
    %c0_i32_0 = arith.constant 0 : i32
    return %arg0, %c0_i32 : i32, i32
  }
}

</mosaic_0001>

<bundles_post_ra>
// kernel: tpu_custom_call.1
= control target key start
LH: loop header
LB: loop body
LE: loop exit
PB: predicated region body
PF: predicated region fallthrough
CT: control target
= control target key end

     0   :  { %18 = vsyncpa [#allocation3], 0  ;;  %s1496_s0 = inlined_call_operand.hbm [shape: f32[8,128], index: 0, kind: input, shape index: {}]   ;;  %s1497_s1 = inlined_call_operand.hbm [shape: f32[128,128], index: 1, kind: input, shape index: {}]   ;;  %s1498_s2 = inlined_call_operand.vmem [shape: f32[1,128], index: 2, kind: input, shape index: {}]   ;;  %s1499_s3 = inlined_call_operand.hbm [shape: f32[128,128], index: 3, kind: input, shape index: {}]   ;;  %s1500_s4 = inlined_call_operand.vmem [shape: f32[1,128], index: 4, kind: input, shape index: {}]   ;;  %s1501_s5 = inlined_call_operand.hbm [shape: f32[128,128], index: 5, kind: input, shape index: {}]   ;;  %s1502_s6 = inlined_call_operand.vmem [shape: f32[1,128], index: 6, kind: input, shape index: {}]   ;;  %s1503_s7 = inlined_call_operand.hbm [shape: f32[128,128], index: 7, kind: input, shape index: {}]   ;;  %s1504_s8 = inlined_call_operand.vmem [shape: f32[1,128], index: 8, kind: input, shape index: {}]   ;;  %s1505_s9 = inlined_call_operand.hbm [shape: f32[128,128], index: 9, kind: input, shape index: {}]   ;;  %s1506_s10 = inlined_call_operand.vmem [shape: f32[1,128], index: 10, kind: input, shape index: {}]   ;;  %s1507_s11 = inlined_call_operand.hbm [shape: f32[128,128], index: 11, kind: input, shape index: {}]   ;;  %s1508_s12 = inlined_call_operand.vmem [shape: f32[1,128], index: 12, kind: input, shape index: {}]   ;;  %s1509_s13 = inlined_call_operand.hbm [shape: f32[8,128], index: 13, kind: output, shape index: {}]  }
   0x1   :  { %19 = vsyncpa [#allocation6], 0 }
   0x2   :  { %20 = vsyncpa [#allocation9], 0 }
   0x3   :  { %21 = vsyncpa [#allocation12], 0 }
   0x4   :  { %22 = vsyncpa [#allocation4], 0  ;;  %s1240_s25 = smov [#allocation5]  }
   0x5   :  { %s38_s26 = sshll.u32 %s1240_s25, 4  ;;  %s39_s26 = int_to_ptr.vmem [resolvable:$true] %s38_s26 }
   0x6   :  { %s1078_s27 = scalar_lea.vmem %s39_s26, 2048  ;;  %p1083_p1 = scmp.lt.s32.totalorder %s39_s26, %s39_s26 }
   0x7   :  { %p1079_p0 = scmp.ne.s32.totalorder %s39_s26, %s1078_s27  ;;  %p1084_p2 = scmp.lt.s32.totalorder %s1078_s27, %s1078_s27 }
   0x9   :  { %p1085_p3 = por %p1084_p2, %p1083_p1 }
   0xb   :  { %p1086_p4 = pnand %p1085_p3, %p1079_p0 }
   0xd   :  { %1089 = shalt.err (!%p1086_p4)
}
   0xe   :  { %s1241_s28 = smov 128   ;;  %s1242_s29 = smov 8  }
   0xf   :  { %44 = dma.hbm_to_vmem [thread:$0]  %s1497_s1, 2048, %s39_s26, [#allocation6], %s1241_s28, %s1241_s28, %s1242_s29  }
  0x10   :  { %s1243_s15 = smov [#allocation8]   ;;  %s1244_s17 = smov [#allocation11]  }
  0x11   :  { %s66_s16 = sshll.u32 %s1243_s15, 4  ;;  %s94_s18 = sshll.u32 %s1244_s17, 4  ;;  %s67_s16 = int_to_ptr.vmem [resolvable:$true] %s66_s16  ;;  %s95_s18 = int_to_ptr.vmem [resolvable:$true] %s94_s18 }
  0x12   :  { %s1098_s19 = scalar_lea.vmem %s67_s16, 2048  ;;  %p1103_p6 = scmp.lt.s32.totalorder %s67_s16, %s67_s16 }
  0x13   :  { %p1099_p5 = scmp.ne.s32.totalorder %s67_s16, %s1098_s19  ;;  %p1104_p7 = scmp.lt.s32.totalorder %s1098_s19, %s1098_s19 }
  0x15   :  { %p1105_p8 = por %p1104_p7, %p1103_p6 }
  0x17   :  { %p1106_p9 = pnand %p1105_p8, %p1099_p5 }
  0x19   :  { %1109 = shalt.err (!%p1106_p9)
}
  0x1a   :  { %72 = dma.hbm_to_vmem [thread:$0]  %s1501_s5, 2048, %s67_s16, [#allocation9], %s1241_s28, %s1241_s28, %s1242_s29  }
  0x1b   :  { %s1118_s1 = scalar_lea.vmem %s95_s18, 2048  ;;  %p1123_p11 = scmp.lt.s32.totalorder %s95_s18, %s95_s18 }
  0x1c   :  { %p1119_p10 = scmp.ne.s32.totalorder %s95_s18, %s1118_s1  ;;  %p1124_p12 = scmp.lt.s32.totalorder %s1118_s1, %s1118_s1 }
  0x1e   :  { %p1125_p13 = por %p1124_p12, %p1123_p11 }
  0x20   :  { %p1126_p0 = pnand %p1125_p13, %p1119_p10 }
  0x22   :  { %1129 = shalt.err (!%p1126_p0)
}
  0x23   :  { %100 = dma.hbm_to_vmem [thread:$0]  %s1505_s9, 2048, %s95_s18, [#allocation12], %s1241_s28, %s1241_s28, %s1242_s29  }
  0x24   :  { %s1245_s24 = smov [#allocation2]   ;;  %s1246_s26 = smov [#allocation7]  }
  0x25   :  { %s29_s25 = sshll.u32 %s1245_s24, 4  ;;  %s52_s5 = sshll.u32 %s1246_s26, 4  ;;  %s30_s25 = int_to_ptr.vmem [resolvable:$true] %s29_s25  ;;  %s53_s5 = int_to_ptr.vmem [resolvable:$true] %s52_s5 }
  0x26   :  { %s1138_s27 = scalar_lea.vmem %s30_s25, 128  ;;  %p1143_p2 = scmp.lt.s32.totalorder %s30_s25, %s30_s25 }
  0x27   :  { %p1139_p1 = scmp.ne.s32.totalorder %s30_s25, %s1138_s27  ;;  %p1144_p3 = scmp.lt.s32.totalorder %s1138_s27, %s1138_s27 }
  0x29   :  { %p1145_p4 = por %p1144_p3, %p1143_p2 }
  0x2b   :  { %p1146_p5 = pnand %p1145_p4, %p1139_p1 }
  0x2d   :  { %1149 = shalt.err (!%p1146_p5)
}
  0x2e   :  { %32 = dma.hbm_to_vmem [thread:$0]  %s1496_s0, 128, %s30_s25, [#allocation3]  }
  0x2f   :  { %s1158_s15 = scalar_lea.vmem %s53_s5, 2048  ;;  %p1163_p7 = scmp.lt.s32.totalorder %s53_s5, %s53_s5 }
  0x30   :  { %p1159_p6 = scmp.ne.s32.totalorder %s53_s5, %s1158_s15  ;;  %p1164_p8 = scmp.lt.s32.totalorder %s1158_s15, %s1158_s15 }
  0x32   :  { %p1165_p9 = por %p1164_p8, %p1163_p7 }
  0x34   :  { %p1166_p10 = pnand %p1165_p9, %p1159_p6 }
  0x36   :  { %1169 = shalt.err (!%p1166_p10)
}
  0x37   :  { %58 = dma.hbm_to_vmem [thread:$0]  %s1499_s3, 2048, %s53_s5, [#allocation6], %s1241_s28, %s1241_s28, %s1242_s29  }
  0x38   :  { %s1247_s17 = smov [#allocation10]   ;;  %s1248_s19 = smov [#allocation13]  }
  0x39   :  { %s80_s18 = sshll.u32 %s1247_s17, 4  ;;  %s108_s0 = sshll.u32 %s1248_s19, 4  ;;  %s81_s18 = int_to_ptr.vmem [resolvable:$true] %s80_s18  ;;  %s109_s0 = int_to_ptr.vmem [resolvable:$true] %s108_s0 }
  0x3a   :  { %s1178_s20 = scalar_lea.vmem %s81_s18, 2048  ;;  %p1183_p12 = scmp.lt.s32.totalorder %s81_s18, %s81_s18 }
  0x3b   :  { %p1179_p11 = scmp.ne.s32.totalorder %s81_s18, %s1178_s20  ;;  %p1184_p13 = scmp.lt.s32.totalorder %s1178_s20, %s1178_s20 }
  0x3d   :  { %p1185_p0 = por %p1184_p13, %p1183_p12 }
  0x3f   :  { %p1186_p1 = pnand %p1185_p0, %p1179_p11 }
  0x41   :  { %1189 = shalt.err (!%p1186_p1)
}
  0x42   :  { %86 = dma.hbm_to_vmem [thread:$0]  %s1503_s7, 2048, %s81_s18, [#allocation9], %s1241_s28, %s1241_s28, %s1242_s29  }
  0x43   :  { %s1198_s3 = scalar_lea.vmem %s109_s0, 2048  ;;  %p1203_p3 = scmp.lt.s32.totalorder %s109_s0, %s109_s0 }
  0x44   :  { %p1199_p2 = scmp.ne.s32.totalorder %s109_s0, %s1198_s3  ;;  %p1204_p4 = scmp.lt.s32.totalorder %s1198_s3, %s1198_s3 }
  0x46   :  { %p1205_p5 = por %p1204_p4, %p1203_p3 }
  0x48   :  { %p1206_p6 = pnand %p1205_p5, %p1199_p2 }
  0x4a   :  { %1209 = shalt.err (!%p1206_p6)
}
  0x4b   :  { %114 = dma.hbm_to_vmem [thread:$0]  %s1507_s11, 2048, %s109_s0, [#allocation12], %s1241_s28, %s1241_s28, %s1242_s29  }
  0x4c   :  { %1230 = dma.done.wait [#allocation3], 128  }
  0x4d   :  { %1231 = vsyncadd [#allocation3], 4294967168 }
  0x4e   :  { %1232 = dma.done.wait [#allocation6], 4096  }
  0x4f   :  { %1233 = vsyncadd [#allocation6], 4294963200 }
  0x50   :  { %1234 = dma.done.wait [#allocation9], 4096  }
  0x51   :  { %1235 = vsyncadd [#allocation9], 4294963200 }
  0x52   :  { %1236 = dma.done.wait [#allocation12], 4096  }
  0x53   :  { %1237 = vsyncadd [#allocation12], 4294963200  ;;  %v1249_v0 = vmov 0.0   ;;  %vm1250_vm0 = vmmov 0   ;;  %v248_v1 = vld [vmem:[#allocation7 + $0x78] sm:$0xff]  ;;  %v247_v2 = vld [vmem:[#allocation7 + $0x70] sm:$0xff] }
  0x54   :  { %873 = vmatprep.subr.mxu1 %v1249_v0  ;;  %838 = vmatprep.subr.mxu0 %v1249_v0  ;;  %v246_v3 = vld [vmem:[#allocation7 + $0x68] sm:$0xff]  ;;  %v245_v4 = vld [vmem:[#allocation7 + $0x60] sm:$0xff]  ;;  %v154_v5 = vld [vmem:[#allocation5 + $0x78] sm:$0xff]  ;;  %s1251_s27 = smov [#allocation14]  }
  0x55   :  { %905 = vmatprep.mubr.msk.f32.mxu1 %vm1250_vm0, %v1249_v0  ;;  %870 = vmatprep.mubr.msk.f32.mxu0 %vm1250_vm0, %v1249_v0  ;;  %v153_v6 = vld [vmem:[#allocation5 + $0x70] sm:$0xff]  ;;  %v244_v7 = vld [vmem:[#allocation7 + $0x58] sm:$0xff]  ;;  %v152_v8 = vld [vmem:[#allocation5 + $0x68] sm:$0xff]  ;;  %s717_s30 = sshll.u32 %s1251_s27, 4  ;;  %s718_s30 = int_to_ptr.vmem [resolvable:$true] %s717_s30 }
  0x56   :  { %874 = vmatpush3.msra.mxu1 %v248_v1  ;;  %839 = vmatpush3.msra.mxu0 %v154_v5  ;;  %v243_v9 = vld [vmem:[#allocation7 + $0x50] sm:$0xff]  ;;  %v151_v10 = vld [vmem:[#allocation5 + $0x60] sm:$0xff]  ;;  %v242_v11 = vld [vmem:[#allocation7 + $0x48] sm:$0xff]  ;;  %s1210_s14 = scalar_lea.vmem %s718_s30, 128  ;;  %p1215_p8 = scmp.lt.s32.totalorder %s718_s30, %s718_s30 }
  0x57   :  { %875 = vmatprep.subr.mxu1 %v1249_v0  ;;  %840 = vmatprep.subr.mxu0 %v1249_v0  ;;  %v150_v12 = vld [vmem:[#allocation5 + $0x58] sm:$0xff]  ;;  %v241_v13 = vld [vmem:[#allocation7 + $0x40] sm:$0xff]  ;;  %v149_v14 = vld [vmem:[#allocation5 + $0x50] sm:$0xff]  ;;  %p1211_p7 = scmp.ne.s32.totalorder %s718_s30, %s1210_s14  ;;  %p1216_p9 = scmp.lt.s32.totalorder %s1210_s14, %s1210_s14 }
  0x58   :  { %876 = vmatpush3.msra.mxu1 %v247_v2  ;;  %841 = vmatpush3.msra.mxu0 %v153_v6  ;;  %v240_v15 = vld [vmem:[#allocation7 + $0x38] sm:$0xff]  ;;  %v148_v16 = vld [vmem:[#allocation5 + $0x48] sm:$0xff]  ;;  %v239_v17 = vld [vmem:[#allocation7 + $0x30] sm:$0xff] }
  0x59   :  { %877 = vmatprep.subr.mxu1 %v1249_v0  ;;  %842 = vmatprep.subr.mxu0 %v1249_v0  ;;  %v147_v18 = vld [vmem:[#allocation5 + $0x40] sm:$0xff]  ;;  %v238_v19 = vld [vmem:[#allocation7 + $0x28] sm:$0xff]  ;;  %v146_v20 = vld [vmem:[#allocation5 + $0x38] sm:$0xff]  ;;  %p1217_p10 = por %p1216_p9, %p1215_p8 }
  0x5a   :  { %878 = vmatpush3.msra.mxu1 %v246_v3  ;;  %843 = vmatpush3.msra.mxu0 %v152_v8  ;;  %v237_v21 = vld [vmem:[#allocation7 + $0x20] sm:$0xff]  ;;  %v145_v22 = vld [vmem:[#allocation5 + $0x30] sm:$0xff]  ;;  %v236_v23 = vld [vmem:[#allocation7 + $0x18] sm:$0xff] }
  0x5b   :  { %879 = vmatprep.subr.mxu1 %v1249_v0  ;;  %844 = vmatprep.subr.mxu0 %v1249_v0  ;;  %v144_v24 = vld [vmem:[#allocation5 + $0x28] sm:$0xff]  ;;  %v235_v25 = vld [vmem:[#allocation7 + $0x10] sm:$0xff]  ;;  %v143_v26 = vld [vmem:[#allocation5 + $0x20] sm:$0xff]  ;;  %p1218_p11 = pnand %p1217_p10, %p1211_p7 }
  0x5c   :  { %880 = vmatpush3.msra.mxu1 %v245_v4  ;;  %845 = vmatpush3.msra.mxu0 %v151_v10  ;;  %v234_v27 = vld [vmem:[#allocation7 + $0x8] sm:$0xff]  ;;  %v142_v28 = vld [vmem:[#allocation5 + $0x18] sm:$0xff]  ;;  %v233_v29 = vld [vmem:[#allocation7] sm:$0xff] }
  0x5d   :  { %881 = vmatprep.subr.mxu1 %v1249_v0  ;;  %846 = vmatprep.subr.mxu0 %v1249_v0  ;;  %v141_v30 = vld [vmem:[#allocation5 + $0x10] sm:$0xff]  ;;  %v1393_v31 = vld [vmem:[#allocation2] sm:$0xff]  ;;  %v140_v32 = vld [vmem:[#allocation5 + $0x8] sm:$0xff] }
  0x5e   :  { %882 = vmatpush3.msra.mxu1 %v244_v7  ;;  %847 = vmatpush3.msra.mxu0 %v150_v12  ;;  %v139_v33 = vld [vmem:[#allocation5] sm:$0xff]  ;;  %v350_v34 = vld [vmem:[#allocation8 + $0x78] sm:$0xff]  ;;  %v349_v35 = vld [vmem:[#allocation8 + $0x70] sm:$0xff] }
  0x5f   :  { %883 = vmatprep.subr.mxu1 %v1249_v0  ;;  %848 = vmatprep.subr.mxu0 %v1249_v0  ;;  %v348_v36 = vld [vmem:[#allocation8 + $0x68] sm:$0xff]  ;;  %v347_v37 = vld [vmem:[#allocation8 + $0x60] sm:$0xff]  ;;  %v346_v38 = vld [vmem:[#allocation8 + $0x58] sm:$0xff] }
  0x60   :  { %884 = vmatpush3.msra.mxu1 %v243_v9  ;;  %849 = vmatpush3.msra.mxu0 %v149_v14  ;;  %v345_v39 = vld [vmem:[#allocation8 + $0x50] sm:$0xff]  ;;  %v344_v40 = vld [vmem:[#allocation8 + $0x48] sm:$0xff]  ;;  %v343_v41 = vld [vmem:[#allocation8 + $0x40] sm:$0xff] }
  0x61   :  { %885 = vmatprep.subr.mxu1 %v1249_v0  ;;  %850 = vmatprep.subr.mxu0 %v1249_v0  ;;  %v342_v42 = vld [vmem:[#allocation8 + $0x38] sm:$0xff]  ;;  %v341_v43 = vld [vmem:[#allocation8 + $0x30] sm:$0xff]  ;;  %v340_v44 = vld [vmem:[#allocation8 + $0x28] sm:$0xff] }
  0x62   :  { %886 = vmatpush3.msra.mxu1 %v242_v11  ;;  %851 = vmatpush3.msra.mxu0 %v148_v16  ;;  %v339_v45 = vld [vmem:[#allocation8 + $0x20] sm:$0xff]  ;;  %v338_v46 = vld [vmem:[#allocation8 + $0x18] sm:$0xff]  ;;  %v337_v47 = vld [vmem:[#allocation8 + $0x10] sm:$0xff] }
  0x63   :  { %887 = vmatprep.subr.mxu1 %v1249_v0  ;;  %852 = vmatprep.subr.mxu0 %v1249_v0  ;;  %v336_v48 = vld [vmem:[#allocation8 + $0x8] sm:$0xff]  ;;  %v335_v49 = vld [vmem:[#allocation8] sm:$0xff]  ;;  %v444_v50 = vld [vmem:[#allocation10 + $0x78] sm:$0xff] }
  0x64   :  { %888 = vmatpush3.msra.mxu1 %v241_v13  ;;  %853 = vmatpush3.msra.mxu0 %v147_v18  ;;  %v443_v51 = vld [vmem:[#allocation10 + $0x70] sm:$0xff]  ;;  %v442_v52 = vld [vmem:[#allocation10 + $0x68] sm:$0xff]  ;;  %v441_v53 = vld [vmem:[#allocation10 + $0x60] sm:$0xff] }
  0x65   :  { %889 = vmatprep.subr.mxu1 %v1249_v0  ;;  %854 = vmatprep.subr.mxu0 %v1249_v0  ;;  %v440_v54 = vld [vmem:[#allocation10 + $0x58] sm:$0xff]  ;;  %v439_v55 = vld [vmem:[#allocation10 + $0x50] sm:$0xff]  ;;  %v438_v56 = vld [vmem:[#allocation10 + $0x48] sm:$0xff] }
  0x66   :  { %890 = vmatpush3.msra.mxu1 %v240_v15  ;;  %855 = vmatpush3.msra.mxu0 %v146_v20  ;;  %v730_v57 = vld [vmem:[%s1500_s4] ss:$0 sm:$0xff]  ;;  %v437_v10 = vld [vmem:[#allocation10 + $0x40] sm:$0xff]  ;;  %v435_v12 = vld [vmem:[#allocation10 + $0x30] sm:$0xff] }
  0x67   :  { %891 = vmatprep.subr.mxu1 %v1249_v0  ;;  %856 = vmatprep.subr.mxu0 %v1249_v0  ;;  %v729_v3 = vld [vmem:[%s1498_s2] ss:$0 sm:$0xff]  ;;  %v434_v13 = vld [vmem:[#allocation10 + $0x28] sm:$0xff]  ;;  %v433_v14 = vld [vmem:[#allocation10 + $0x20] sm:$0xff] }
  0x68   :  { %892 = vmatpush3.msra.mxu1 %v239_v17  ;;  %857 = vmatpush3.msra.mxu0 %v145_v22  ;;  %v436_v11 = vld [vmem:[#allocation10 + $0x38] sm:$0xff]  ;;  %v431_v16 = vld [vmem:[#allocation10 + $0x10] sm:$0xff]  ;;  %v430_v17 = vld [vmem:[#allocation10 + $0x8] sm:$0xff] }
  0x69   :  { %893 = vmatprep.subr.mxu1 %v1249_v0  ;;  %858 = vmatprep.subr.mxu0 %v1249_v0  ;;  %v432_v15 = vld [vmem:[#allocation10 + $0x18] sm:$0xff]  ;;  %v429_v18 = vld [vmem:[#allocation10] sm:$0xff]  ;;  %v537_v20 = vld [vmem:[#allocation11 + $0x70] sm:$0xff] }
  0x6a   :  { %894 = vmatpush3.msra.mxu1 %v238_v19  ;;  %859 = vmatpush3.msra.mxu0 %v144_v24  ;;  %v538_v19 = vld [vmem:[#allocation11 + $0x78] sm:$0xff]  ;;  %v535_v22 = vld [vmem:[#allocation11 + $0x60] sm:$0xff]  ;;  %v533_v24 = vld [vmem:[#allocation11 + $0x50] sm:$0xff] }
  0x6b   :  { %895 = vmatprep.subr.mxu1 %v1249_v0  ;;  %860 = vmatprep.subr.mxu0 %v1249_v0 }
  0x6c   :  { %896 = vmatpush3.msra.mxu1 %v237_v21  ;;  %861 = vmatpush3.msra.mxu0 %v143_v26  ;;  %v536_v21 = vld [vmem:[#allocation11 + $0x68] sm:$0xff]  ;;  %v732_v26 = vld [vmem:[%s1502_s6] ss:$0 sm:$0xff] }
  0x6d   :  { %897 = vmatprep.subr.mxu1 %v1249_v0  ;;  %862 = vmatprep.subr.mxu0 %v1249_v0 }
  0x6e   :  { %898 = vmatpush3.msra.mxu1 %v236_v23  ;;  %863 = vmatpush3.msra.mxu0 %v142_v28  ;;  %v534_v23 = vld [vmem:[#allocation11 + $0x58] sm:$0xff] }
  0x6f   :  { %899 = vmatprep.subr.mxu1 %v1249_v0  ;;  %864 = vmatprep.subr.mxu0 %v1249_v0 }
  0x70   :  { %900 = vmatpush3.msra.mxu1 %v235_v25  ;;  %865 = vmatpush3.msra.mxu0 %v141_v30  ;;  %v532_v25 = vld [vmem:[#allocation11 + $0x48] sm:$0xff] }
  0x71   :  { %901 = vmatprep.subr.mxu1 %v1249_v0  ;;  %866 = vmatprep.subr.mxu0 %v1249_v0 }
  0x72   :  { %902 = vmatpush3.msra.mxu1 %v234_v27  ;;  %867 = vmatpush3.msra.mxu0 %v140_v32  ;;  %v530_v32 = vld [vmem:[#allocation11 + $0x38] sm:$0xff] }
  0x73   :  { %903 = vmatprep.subr.mxu1 %v1249_v0  ;;  %868 = vmatprep.subr.mxu0 %v1249_v0 }
  0x74   :  { %904 = vmatpush3.msra.mxu1 %v233_v29  ;;  %869 = vmatpush3.msra.mxu0 %v139_v33  ;;  %v529_v33 = vld [vmem:[#allocation11 + $0x30] sm:$0xff] }
  0x75   :  { %906 = vmatmul.mubr.f32.vlgmr.msra.gmra.mxu1 %v1393_v31  ;;  %943 = vmatprep.subr.mxu1 %v1249_v0 }
  0x76   :  { %975 = vmatprep.mubr.msk.f32.mxu1 %vm1250_vm0, %v1249_v0  ;;  %871 = vmatmul.mubr.f32.vlgmr.msra.gmra.mxu0 %v1393_v31 }
  0x77   :  { %908 = vmatprep.subr.mxu0 %v1249_v0  ;;  %940 = vmatprep.mubr.msk.f32.mxu0 %vm1250_vm0, %v1249_v0 }
  0x78   :  { %909 = vmatpush3.msra.mxu0 %v350_v34  ;;  %944 = vmatpush3.msra.mxu1 %v444_v50  ;;  %v528_v34 = vld [vmem:[#allocation11 + $0x28] sm:$0xff] }
  0x79   :  { %910 = vmatprep.subr.mxu0 %v1249_v0  ;;  %945 = vmatprep.subr.mxu1 %v1249_v0 }
  0x7a   :  { %911 = vmatpush3.msra.mxu0 %v349_v35  ;;  %946 = vmatpush3.msra.mxu1 %v443_v51  ;;  %v527_v35 = vld [vmem:[#allocation11 + $0x20] sm:$0xff] }
  0x7b   :  { %912 = vmatprep.subr.mxu0 %v1249_v0  ;;  %947 = vmatprep.subr.mxu1 %v1249_v0 }
  0x7c   :  { %913 = vmatpush3.msra.mxu0 %v348_v36  ;;  %948 = vmatpush3.msra.mxu1 %v442_v52  ;;  %v526_v36 = vld [vmem:[#allocation11 + $0x18] sm:$0xff]  ;;  %v625_v52 = vld [vmem:[#allocation13 + $0x40] sm:$0xff] }
  0x7d   :  { %914 = vmatprep.subr.mxu0 %v1249_v0  ;;  %949 = vmatprep.subr.mxu1 %v1249_v0 }
  0x7e   :  { %915 = vmatpush3.msra.mxu0 %v347_v37  ;;  %950 = vmatpush3.msra.mxu1 %v441_v53  ;;  %v525_v37 = vld [vmem:[#allocation11 + $0x10] sm:$0xff]  ;;  %v624_v53 = vld [vmem:[#allocation13 + $0x38] sm:$0xff] }
  0x7f   :  { %916 = vmatprep.subr.mxu0 %v1249_v0  ;;  %951 = vmatprep.subr.mxu1 %v1249_v0 }
  0x80   :  { %917 = vmatpush3.msra.mxu0 %v346_v38  ;;  %952 = vmatpush3.msra.mxu1 %v440_v54  ;;  %v524_v38 = vld [vmem:[#allocation11 + $0x8] sm:$0xff]  ;;  %v623_v54 = vld [vmem:[#allocation13 + $0x30] sm:$0xff] }
  0x81   :  { %918 = vmatprep.subr.mxu0 %v1249_v0  ;;  %953 = vmatprep.subr.mxu1 %v1249_v0 }
  0x82   :  { %919 = vmatpush3.msra.mxu0 %v345_v39  ;;  %954 = vmatpush3.msra.mxu1 %v439_v55  ;;  %v523_v39 = vld [vmem:[#allocation11] sm:$0xff]  ;;  %v622_v55 = vld [vmem:[#allocation13 + $0x28] sm:$0xff] }
  0x83   :  { %920 = vmatprep.subr.mxu0 %v1249_v0  ;;  %955 = vmatprep.subr.mxu1 %v1249_v0 }
  0x84   :  { %921 = vmatpush3.msra.mxu0 %v344_v40  ;;  %956 = vmatpush3.msra.mxu1 %v438_v56  ;;  %v632_v40 = vld [vmem:[#allocation13 + $0x78] sm:$0xff]  ;;  %v621_v56 = vld [vmem:[#allocation13 + $0x20] sm:$0xff] }
  0x85   :  { %922 = vmatprep.subr.mxu0 %v1249_v0  ;;  %957 = vmatprep.subr.mxu1 %v1249_v0 }
  0x86   :  { %923 = vmatpush3.msra.mxu0 %v343_v41  ;;  %958 = vmatpush3.msra.mxu1 %v437_v10  ;;  %v631_v41 = vld [vmem:[#allocation13 + $0x70] sm:$0xff] }
  0x87   :  { %924 = vmatprep.subr.mxu0 %v1249_v0  ;;  %959 = vmatprep.subr.mxu1 %v1249_v0 }
  0x88   :  { %925 = vmatpush3.msra.mxu0 %v342_v42  ;;  %960 = vmatpush3.msra.mxu1 %v436_v11  ;;  %v630_v42 = vld [vmem:[#allocation13 + $0x68] sm:$0xff] }
  0x89   :  { %926 = vmatprep.subr.mxu0 %v1249_v0  ;;  %961 = vmatprep.subr.mxu1 %v1249_v0 }
  0x8a   :  { %927 = vmatpush3.msra.mxu0 %v341_v43  ;;  %962 = vmatpush3.msra.mxu1 %v435_v12  ;;  %v629_v43 = vld [vmem:[#allocation13 + $0x60] sm:$0xff] }
  0x8b   :  { %928 = vmatprep.subr.mxu0 %v1249_v0  ;;  %963 = vmatprep.subr.mxu1 %v1249_v0 }
  0x8c   :  { %929 = vmatpush3.msra.mxu0 %v340_v44  ;;  %964 = vmatpush3.msra.mxu1 %v434_v13  ;;  %v628_v44 = vld [vmem:[#allocation13 + $0x58] sm:$0xff] }
  0x8d   :  { %930 = vmatprep.subr.mxu0 %v1249_v0  ;;  %965 = vmatprep.subr.mxu1 %v1249_v0 }
  0x8e   :  { %931 = vmatpush3.msra.mxu0 %v339_v45  ;;  %966 = vmatpush3.msra.mxu1 %v433_v14  ;;  %v627_v45 = vld [vmem:[#allocation13 + $0x50] sm:$0xff] }
  0x8f   :  { %932 = vmatprep.subr.mxu0 %v1249_v0  ;;  %967 = vmatprep.subr.mxu1 %v1249_v0 }
  0x90   :  { %933 = vmatpush3.msra.mxu0 %v338_v46  ;;  %968 = vmatpush3.msra.mxu1 %v432_v15  ;;  %v626_v46 = vld [vmem:[#allocation13 + $0x48] sm:$0xff] }
  0x91   :  { %934 = vmatprep.subr.mxu0 %v1249_v0  ;;  %969 = vmatprep.subr.mxu1 %v1249_v0 }
  0x92   :  { %935 = vmatpush3.msra.mxu0 %v337_v47  ;;  %970 = vmatpush3.msra.mxu1 %v431_v16  ;;  %v733_v47 = vld [vmem:[%s1504_s8] ss:$0 sm:$0xff] }
  0x93   :  { %936 = vmatprep.subr.mxu0 %v1249_v0  ;;  %971 = vmatprep.subr.mxu1 %v1249_v0 }
  0x94   :  { %937 = vmatpush3.msra.mxu0 %v336_v48  ;;  %972 = vmatpush3.msra.mxu1 %v430_v17 }
  0x95   :  { %938 = vmatprep.subr.mxu0 %v1249_v0  ;;  %973 = vmatprep.subr.mxu1 %v1249_v0 }
  0x96   :  { %939 = vmatpush3.msra.mxu0 %v335_v49  ;;  %974 = vmatpush3.msra.mxu1 %v429_v18 }
  0x97   :  { %978 = vmatprep.subr.mxu0 %v1249_v0  ;;  %1013 = vmatprep.subr.mxu1 %v1249_v0 }
 0x135   :  { %v322_v58 = vpop.f32.mrf.mxu1 }
 0x136   :  { %v323_v59 = vadd.f32 %v730_v57, %v322_v58  ;;  %v228_v62 = vpop.f32.mrf.mxu0  ;;  %v620_v57 = vld [vmem:[#allocation13 + $0x18] sm:$0xff]  ;;  %v619_v58 = vld [vmem:[#allocation13 + $0x10] sm:$0xff] }
 0x137   :  { %v907_v60 = vpop.f32.mrf.mxu1  ;;  %v229_v4 = vadd.f32 %v729_v3, %v228_v62  ;;  %v735_v3 = vld [vmem:[%s1508_s12] ss:$0 sm:$0xff] }
 0x138   :  { %v731_v61 = vmul.f32 -1.442695, %v323_v59  ;;  %v872_v63 = vpop.f32.mrf.mxu0  ;;  %v618_v59 = vld [vmem:[#allocation13 + $0x8] sm:$0xff]  ;;  %v617_v60 = vld [vmem:[#allocation13] sm:$0xff] }
 0x139   :  { %v232_v5 = vmax.f32 %v229_v4, 0.0 }
 0x13a   :  { %1060 = vpow2.f32 %v731_v61  ;;  %v734_v61 = vld [vmem:[%s1506_s10] ss:$0 sm:$0xff] }
 0x13b   :  { %v332_v6 = vsub.f32 %v232_v5, %v1393_v31 }
 0x147   :  { %v1061_v1 = vpop.eup %1060 }
 0x148   :  { %v329_v2 = vadd.f32 1.0, %v1061_v1 }
 0x14a   :  { %1062 = vrcp.f32 %v329_v2 }
 0x157   :  { %v1063_v7 = vpop.eup %1062 }
 0x158   :  { %v333_v8 = vmul.f32 %v1063_v7, %v332_v6 }
 0x15a   :  { %v334_v9 = vadd.f32 %v333_v8, %v1393_v31  ;;  %v531_v31 = vld [vmem:[#allocation11 + $0x40] sm:$0xff] }
 0x15c   :  { %941 = vmatmul.mubr.f32.vlgmr.msra.gmra.mxu0 %v334_v9 }
 0x15d   :  { %1010 = vmatprep.mubr.msk.f32.mxu0 %vm1250_vm0, %v1249_v0  ;;  %979 = vmatpush3.msra.mxu0 %v538_v19 }
 0x15e   :  { %980 = vmatprep.subr.mxu0 %v1249_v0 }
 0x15f   :  { %981 = vmatpush3.msra.mxu0 %v537_v20 }
 0x160   :  { %982 = vmatprep.subr.mxu0 %v1249_v0 }
 0x161   :  { %983 = vmatpush3.msra.mxu0 %v536_v21 }
 0x162   :  { %984 = vmatprep.subr.mxu0 %v1249_v0 }
 0x163   :  { %985 = vmatpush3.msra.mxu0 %v535_v22 }
 0x164   :  { %986 = vmatprep.subr.mxu0 %v1249_v0 }
 0x165   :  { %987 = vmatpush3.msra.mxu0 %v534_v23 }
 0x166   :  { %988 = vmatprep.subr.mxu0 %v1249_v0 }
 0x167   :  { %989 = vmatpush3.msra.mxu0 %v533_v24 }
 0x168   :  { %990 = vmatprep.subr.mxu0 %v1249_v0 }
 0x169   :  { %991 = vmatpush3.msra.mxu0 %v532_v25 }
 0x16a   :  { %992 = vmatprep.subr.mxu0 %v1249_v0 }
 0x16b   :  { %993 = vmatpush3.msra.mxu0 %v531_v31 }
 0x16c   :  { %994 = vmatprep.subr.mxu0 %v1249_v0 }
 0x16d   :  { %995 = vmatpush3.msra.mxu0 %v530_v32 }
 0x16e   :  { %996 = vmatprep.subr.mxu0 %v1249_v0 }
 0x16f   :  { %997 = vmatpush3.msra.mxu0 %v529_v33 }
 0x170   :  { %998 = vmatprep.subr.mxu0 %v1249_v0 }
 0x171   :  { %999 = vmatpush3.msra.mxu0 %v528_v34 }
 0x172   :  { %1000 = vmatprep.subr.mxu0 %v1249_v0 }
 0x173   :  { %1001 = vmatpush3.msra.mxu0 %v527_v35 }
 0x174   :  { %1002 = vmatprep.subr.mxu0 %v1249_v0 }
 0x175   :  { %1003 = vmatpush3.msra.mxu0 %v526_v36 }
 0x176   :  { %1004 = vmatprep.subr.mxu0 %v1249_v0 }
 0x177   :  { %1005 = vmatpush3.msra.mxu0 %v525_v37 }
 0x178   :  { %1006 = vmatprep.subr.mxu0 %v1249_v0 }
 0x179   :  { %1007 = vmatpush3.msra.mxu0 %v524_v38 }
 0x17a   :  { %1008 = vmatprep.subr.mxu0 %v1249_v0 }
 0x17b   :  { %1009 = vmatpush3.msra.mxu0 %v523_v39 }
 0x21c   :  { %v424_v27 = vpop.f32.mrf.mxu0 }
 0x21d   :  { %v425_v28 = vadd.f32 %v732_v26, %v424_v27 }
 0x21e   :  { %v942_v29 = vpop.f32.mrf.mxu0 }
 0x21f   :  { %1064 = vtanh.f32 %v425_v28 }
 0x22c   :  { %v1065_v30 = vpop.eup %1064 }
 0x22d   :  { %976 = vmatmul.mubr.f32.vlgmr.msra.gmra.mxu1 %v1065_v30 }
 0x22e   :  { %1045 = vmatprep.mubr.msk.f32.mxu1 %vm1250_vm0, %v1249_v0  ;;  %1014 = vmatpush3.msra.mxu1 %v632_v40 }
 0x22f   :  { %1015 = vmatprep.subr.mxu1 %v1249_v0 }
 0x230   :  { %1016 = vmatpush3.msra.mxu1 %v631_v41 }
 0x231   :  { %1017 = vmatprep.subr.mxu1 %v1249_v0 }
 0x232   :  { %1018 = vmatpush3.msra.mxu1 %v630_v42 }
 0x233   :  { %1019 = vmatprep.subr.mxu1 %v1249_v0 }
 0x234   :  { %1020 = vmatpush3.msra.mxu1 %v629_v43 }
 0x235   :  { %1021 = vmatprep.subr.mxu1 %v1249_v0 }
 0x236   :  { %1022 = vmatpush3.msra.mxu1 %v628_v44 }
 0x237   :  { %1023 = vmatprep.subr.mxu1 %v1249_v0 }
 0x238   :  { %1024 = vmatpush3.msra.mxu1 %v627_v45 }
 0x239   :  { %1025 = vmatprep.subr.mxu1 %v1249_v0 }
 0x23a   :  { %1026 = vmatpush3.msra.mxu1 %v626_v46 }
 0x23b   :  { %1027 = vmatprep.subr.mxu1 %v1249_v0 }
 0x23c   :  { %1028 = vmatpush3.msra.mxu1 %v625_v52 }
 0x23d   :  { %1029 = vmatprep.subr.mxu1 %v1249_v0 }
 0x23e   :  { %1030 = vmatpush3.msra.mxu1 %v624_v53 }
 0x23f   :  { %1031 = vmatprep.subr.mxu1 %v1249_v0 }
 0x240   :  { %1032 = vmatpush3.msra.mxu1 %v623_v54 }
 0x241   :  { %1033 = vmatprep.subr.mxu1 %v1249_v0 }
 0x242   :  { %1034 = vmatpush3.msra.mxu1 %v622_v55 }
 0x243   :  { %1035 = vmatprep.subr.mxu1 %v1249_v0 }
 0x244   :  { %1036 = vmatpush3.msra.mxu1 %v621_v56 }
 0x245   :  { %1037 = vmatprep.subr.mxu1 %v1249_v0 }
 0x246   :  { %1038 = vmatpush3.msra.mxu1 %v620_v57 }
 0x247   :  { %1039 = vmatprep.subr.mxu1 %v1249_v0 }
 0x248   :  { %1040 = vmatpush3.msra.mxu1 %v619_v58 }
 0x249   :  { %1041 = vmatprep.subr.mxu1 %v1249_v0 }
 0x24a   :  { %1042 = vmatpush3.msra.mxu1 %v618_v59 }
 0x24b   :  { %1043 = vmatprep.subr.mxu1 %v1249_v0 }
 0x24c   :  { %1044 = vmatpush3.msra.mxu1 %v617_v60 }
 0x2ed   :  { %v518_v48 = vpop.f32.mrf.mxu1 }
 0x2ee   :  { %v519_v49 = vadd.f32 %v733_v47, %v518_v48 }
 0x2ef   :  { %v977_v50 = vpop.f32.mrf.mxu1 }
 0x2f0   :  { %1066 = vtanh.f32 %v519_v49 }
 0x2fd   :  { %v1067_v51 = vpop.eup %1066 }
 0x2fe   :  { %1011 = vmatmul.mubr.f32.vlgmr.msra.gmra.mxu0 %v1067_v51 }
 0x3be   :  { %v612_v62 = vpop.f32.mrf.mxu0 }
 0x3bf   :  { %v613_v63 = vadd.f32 %v734_v61, %v612_v62 }
 0x3c0   :  { %v1012_v1 = vpop.f32.mrf.mxu0 }
 0x3c1   :  { %1068 = vtanh.f32 %v613_v63 }
 0x3ce   :  { %v1069_v2 = vpop.eup %1068 }
 0x3cf   :  { %1046 = vmatmul.mubr.f32.vlgmr.msra.gmra.mxu1 %v1069_v2 }
 0x48f   :  { %v706_v4 = vpop.f32.mrf.mxu1 }
 0x490   :  { %v707_v5 = vadd.f32 %v735_v3, %v706_v4 }
 0x491   :  { %v1047_v0 = vpop.f32.mrf.mxu1 }
 0x492   :  { %710 = vst [vmem:[#allocation14] sm:$0xff] %v707_v5 }
 0x493   :  { %1221 = shalt.err (!%p1218_p11)
}
 0x494   :  { %720 = dma.vmem_to_hbm [thread:$0]  %s718_s30, 128, %s1509_s13, [#allocation4]  }
 0x495   :  { %1238 = dma.done.wait [#allocation4], 128  }
 0x496   :  { %1239 = vsyncadd [#allocation4], 4294967168 }
 0x497   :  { %724 = vsyncpa [#allocation3], 1 }
 0x498   :  { %725 = vsyncpa [#allocation6], 1 }
 0x499   :  { %726 = vsyncpa [#allocation9], 1 }
 0x49a   :  { %727 = vsyncpa [#allocation12], 1 }
 0x49b   :  { %728 = vsyncpa [#allocation4], 1 }

</bundles_post_ra>
